<compile_context>
chip_gen: v6e
topology: v6e:2x2x1
jax: 0.10.0
libtpu: 0.0.40
codegen_flags: <defaults>
</compile_context>

<pallas_src>
import functools

import jax
import jax.numpy as jnp
from jax.experimental import pallas as pl
from jax.experimental.pallas import tpu as pltpu


# ----------------------------------------------------------------------------
# Tiling helpers
# ----------------------------------------------------------------------------
def _round_up(x, m):
    return ((x + m - 1) // m) * m


def _cdiv(a, b):
    return (a + b - 1) // b


def _plan_gray_tiling(hw, *, lane=512, max_block_elems=512 * 1024):
    """Pick (lane L, rows-per-block S, total padded rows R) for the gray kernel.

    L is a multiple of 128 (lane-dense).  S is a multiple of 16 (bf16 sublane-
    dense) unless the whole image fits in one block, in which case S == R
    (full-extent block, always legal).  max_block_elems=512K gives a ~6 MiB
    f32 input block + ~1 MiB bf16 output block => ~14 MiB double-buffered,
    which fits every generation once vmem_limit_bytes is set explicitly.
    """
    lane = min(lane, _round_up(hw, 128))            # small images: shrink lane
    rows = _cdiv(hw, lane)                          # unpadded row count
    max_rows = max(16, ((max_block_elems // lane) // 16) * 16)
    if rows <= max_rows:
        s = rows                                    # single full-extent block
        rows_padded = rows
    else:
        s = max_rows
        rows_padded = _round_up(rows, s)            # grid divides evenly
    return lane, s, rows_padded


def _plan_pad_batch(b):
    """(TB, padded B) for the descriptor-pad kernel.

    TB is the full batch for tiny batches, otherwise a multiple of 8 chosen so
    the grid has >= 2 steps (lets the parallel axis shard across v7x's 2 TCs).
    """
    if b <= 8:
        return b, b                                 # full-extent block, legal
    b_pad = _round_up(b, 8)
    tb = 8
    for cand in (128, 64, 32, 16, 8):
        if b_pad % cand == 0 and b_pad // cand >= 2:
            tb = cand
            break
    return tb, b_pad


# ----------------------------------------------------------------------------
# Kernel 1: RGB (NCHW float in [0,1]) -> grayscale.
#   ToPILImage (.mul(255).byte() == floor for in-range inputs) followed by
#   cv2 RGB->BGR->GRAY, whose fixed-point form is
#     gray = (R*4899 + G*9617 + B*1868 + 8192) >> 14   on the uint8 image.
#   All intermediates are integers < 2^23, so f32 arithmetic is exact.
#   NOTE: clip(0,1) differs from .byte()'s modulo-256 wrap only for inputs
#   outside [0,1], which normalized images never are.
# ----------------------------------------------------------------------------
def _gray_kernel(x_ref, g_ref):
    img = x_ref[...]                                    # (1, 3, S, L) f32
    u8 = jnp.floor(jnp.clip(img, 0.0, 1.0) * 255.0)     # emulate .mul(255).byte()
    r = u8[:, 0, :, :]                                  # (1, S, L) dense planes
    g = u8[:, 1, :, :]
    b = u8[:, 2, :, :]
    acc = r * 4899.0 + g * 9617.0 + b * 1868.0 + 8192.0
    gray = jnp.floor(acc * (1.0 / 16384.0))             # == >> 14, exact in f32
    g_ref[...] = gray.astype(g_ref.dtype)               # bf16: 0..255 exact


def rgb_to_gray(x, *, lane=512, max_block_elems=512 * 1024):
    B, C, H, W = x.shape
    assert C == 3
    HW = H * W
    L, S, R = _plan_gray_tiling(HW, lane=lane, max_block_elems=max_block_elems)
    HW_pad = R * L

    xf = x.reshape(B, C, HW)                            # free, contiguous
    if HW_pad != HW:                                    # ragged HW: pad on host
        xf = jnp.pad(xf, ((0, 0), (0, 0), (0, HW_pad - HW)))
    xf = xf.reshape(B, C, R, L)                         # sublane/lane-dense view

    # Explicit VMEM budget: double-buffered in+out blocks plus margin.
    s_pad = _round_up(S, 16)
    in_block_bytes = C * s_pad * L * 4
    out_block_bytes = s_pad * L * 2
    vmem_limit = 2 * (in_block_bytes + out_block_bytes) + (4 << 20)

    grid = (B, R // S)
    gray = pl.pallas_call(
        _gray_kernel,
        out_shape=jax.ShapeDtypeStruct((B, R, L), jnp.bfloat16),
        grid=grid,
        in_specs=[pl.BlockSpec((1, C, S, L), lambda b, t: (b, 0, t, 0))],
        out_specs=pl.BlockSpec((1, S, L), lambda b, t: (b, t, 0)),
        compiler_params=pltpu.CompilerParams(
            dimension_semantics=("parallel", "parallel"),
            vmem_limit_bytes=vmem_limit),
    )(xf)

    gray = gray.reshape(B, HW_pad)
    if HW_pad != HW:
        gray = gray[:, :HW]
    return gray.reshape(B, H, W)


# ----------------------------------------------------------------------------
# Kernel 2: truncate / zero-pad descriptors and emit the flattened feature
# matrix directly:
#   out[b, m*D + d] = des[b, m, d]  if m < count[b]  else 0
# count[b] == 0 reproduces the `des is None` branch (all-zero feature vector).
# TB images per grid step on the flattened (B, MF*D) layout; the store slab is
# MF*D lanes wide (unmasked, lane-dense).  jnp.where guarantees exact zeros in
# padded rows even if the descriptor buffer holds NaN/Inf beyond counts.
# ----------------------------------------------------------------------------
def _pad_kernel(counts_ref, des_ref, out_ref, *, desc_dim):
    cnt = counts_ref[...]                                        # (TB, 1) int32
    col = jax.lax.broadcasted_iota(jnp.int32, out_ref.shape, 1)  # (TB, MF*D)
    if desc_dim & (desc_dim - 1) == 0:                           # D=128 -> shift
        desc_row = col >> (desc_dim.bit_length() - 1)
    else:
        desc_row = col // desc_dim
    des = des_ref[...]
    out_ref[...] = jnp.where(desc_row < cnt, des, jnp.zeros_like(des))


def pad_descriptors(descriptors, counts, max_features):
    B, MF, D = descriptors.shape
    assert MF == max_features
    feat_dim = MF * D
    TB, B_pad = _plan_pad_batch(B)

    des_flat = descriptors.reshape(B, feat_dim)          # free, contiguous
    counts2d = counts.reshape(B, 1).astype(jnp.int32)
    if B_pad != B:                                        # pad batch on host
        des_flat = jnp.pad(des_flat, ((0, B_pad - B), (0, 0)))
        counts2d = jnp.pad(counts2d, ((0, B_pad - B), (0, 0)))

    tb_pad = _round_up(TB, 8)
    slab_bytes = tb_pad * _round_up(feat_dim, 128) * 4
    vmem_limit = 2 * (2 * slab_bytes + 8 * 128 * 4) + (2 << 20)

    kernel = functools.partial(_pad_kernel, desc_dim=D)
    out = pl.pallas_call(
        kernel,
        out_shape=jax.ShapeDtypeStruct((B_pad, feat_dim), jnp.float32),
        grid=(B_pad // TB,),
        in_specs=[pl.BlockSpec((TB, 1), lambda i: (i, 0)),
                  pl.BlockSpec((TB, feat_dim), lambda i: (i, 0))],
        out_specs=pl.BlockSpec((TB, feat_dim), lambda i: (i, 0)),
        compiler_params=pltpu.CompilerParams(
            dimension_semantics=("parallel",),
            vmem_limit_bytes=vmem_limit),
    )(counts2d, des_flat)
    if B_pad != B:
        out = out[:B]
    return out


# ----------------------------------------------------------------------------
# Full forward wrapper (mirrors CVFeatureExtractionLayer.forward for 'sift')
# ----------------------------------------------------------------------------
def cv_feature_extraction_forward(x, descriptors, counts, max_features=8):
    """
    x:           (B, 3, H, W) float32 in [0, 1]   (NCHW, like PyTorch)
    descriptors: (B, max_features, 128) float32   stand-in for SIFT output
    counts:      (B,) int32 number of valid descriptor rows (<= max_features)
    returns:     (cv_features (B, 128*max_features) f32, gray (B, H, W) bf16)
    """
    # Stage 1: grayscale preprocessing (feeds the CV extractor).
    gray = rgb_to_gray(x)
    # Stage 2: SIFT detectAndCompute -> not representable on TPU (see TODO above).
    # Stage 3: truncate / pad / flatten into the feature matrix (flat output).
    cv_features = pad_descriptors(descriptors, counts, max_features)
    return cv_features, gray


if __name__ == "__main__":
    key = jax.random.PRNGKey(0)
    k_img, k_des, k_img2 = jax.random.split(key, 3)

    B, C, H, W = 2, 3, 16, 16
    MAX_FEATURES = 8          # small stand-in for max_features=100
    DESC_DIM = 128            # SIFT descriptor dim
    FEATURE_DIM = DESC_DIM * MAX_FEATURES

    # Deterministic inputs.
    x = jax.random.uniform(k_img, (B, C, H, W), dtype=jnp.float32)
    descriptors = jax.random.normal(k_des, (B, MAX_FEATURES, DESC_DIM),
                                    dtype=jnp.float32)
    # Poison the unused rows of image 0 with NaN to verify zero-pad semantics.
    descriptors = descriptors.at[0, 5:].set(jnp.nan)
    # Image 0 has 5 valid descriptors (pad branch); image 1 has none
    # (the `des is None` -> zeros branch).
    counts = jnp.array([5, 0], dtype=jnp.int32)

    cv_features, gray = cv_feature_extraction_forward(
        x, descriptors, counts, max_features=MAX_FEATURES)
    jax.block_until_ready(cv_features)
    jax.block_until_ready(gray)

    # --- reference checks (pure JAX, same math) ---
    def gray_ref_fn(img):
        u8 = jnp.floor(jnp.clip(img, 0.0, 1.0) * 255.0)
        return jnp.floor(
            (u8[:, 0] * 4899.0 + u8[:, 1] * 9617.0 + u8[:, 2] * 1868.0 + 8192.0)
            / 16384.0)

    gray_ref = gray_ref_fn(x)
    rows = jnp.arange(MAX_FEATURES)[None, :, None]
    feat_ref = jnp.where(rows < counts[:, None, None], descriptors, 0.0)
    feat_ref = feat_ref.reshape(B, FEATURE_DIM)

    assert cv_features.shape == (B, FEATURE_DIM)
    assert cv_features.dtype == jnp.float32
    assert gray.shape == (B, H, W)
    assert gray.dtype == jnp.bfloat16
    assert jnp.array_equal(gray.astype(jnp.float32), gray_ref)   # 0..255 ints, exact
    assert jnp.array_equal(cv_features, feat_ref)
    assert jnp.all(jnp.isfinite(cv_features))         # NaN padding rows -> zeros
    assert jnp.all(cv_features[1] == 0.0)              # des-is-None path -> zeros

    # Ragged-HW path: 20x20 image (HW=400 not a multiple of 128 -> host pad).
    x2 = jax.random.uniform(k_img2, (B, C, 20, 20), dtype=jnp.float32)
    gray2 = rgb_to_gray(x2)
    jax.block_until_ready(gray2)
    assert gray2.shape == (B, 20, 20)
    assert jnp.array_equal(gray2.astype(jnp.float32), gray_ref_fn(x2))

    print("KERNEL_OK")
</pallas_src>

<mosaic_0001>
module attributes {stable_mosaic.version = 11 : i64} {
  func.func @_gray_kernel(%arg0: i32, %arg1: i32, %arg2: memref<1x3x1x256xf32, #tpu.memory_space<vmem>>, %arg3: memref<1x1x256xbf16, #tpu.memory_space<vmem>>) attributes {dimension_semantics = [#tpu.dimension_semantics<parallel>, #tpu.dimension_semantics<parallel>], iteration_bounds = array<i64: 2, 1>, scalar_prefetch = 0 : i64, scratch_operands = 0 : i64, tpu.core_type = #tpu.core_type<tc>, window_params = [{transform_indices = @transform_0, window_bounds = array<i64: 1, 3, 1, 256>}, {transform_indices = @transform_1, window_bounds = array<i64: 1, 1, 256>}]} {
    %c0 = arith.constant 0 : index
    %c0_0 = arith.constant 0 : index
    %c0_1 = arith.constant 0 : index
    %c0_2 = arith.constant 0 : index
    %0 = vector.load %arg2[%c0, %c0_0, %c0_1, %c0_2] : memref<1x3x1x256xf32, #tpu.memory_space<vmem>>, vector<1x3x1x256xf32>
    %cst = arith.constant 0.000000e+00 : f32
    %cst_3 = arith.constant 1.000000e+00 : f32
    %1 = vector.broadcast %cst : f32 to vector<1x3x1x256xf32>
    %2 = arith.maximumf %1, %0 : vector<1x3x1x256xf32>
    %3 = vector.broadcast %cst_3 : f32 to vector<1x3x1x256xf32>
    %4 = arith.minimumf %3, %2 : vector<1x3x1x256xf32>
    %cst_4 = arith.constant 2.550000e+02 : f32
    %5 = vector.broadcast %cst_4 : f32 to vector<1x3x1x256xf32>
    %6 = arith.mulf %4, %5 : vector<1x3x1x256xf32>
    %7 = math.floor %6 : vector<1x3x1x256xf32>
    %8 = vector.extract_strided_slice %7 {offsets = [0, 0, 0, 0], sizes = [1, 1, 1, 256], strides = [1, 1, 1, 1]} : vector<1x3x1x256xf32> to vector<1x1x1x256xf32>
    %9 = vector.shape_cast %8 : vector<1x1x1x256xf32> to vector<1x1x256xf32>
    %10 = vector.extract_strided_slice %7 {offsets = [0, 1, 0, 0], sizes = [1, 1, 1, 256], strides = [1, 1, 1, 1]} : vector<1x3x1x256xf32> to vector<1x1x1x256xf32>
    %11 = vector.shape_cast %10 : vector<1x1x1x256xf32> to vector<1x1x256xf32>
    %12 = vector.extract_strided_slice %7 {offsets = [0, 2, 0, 0], sizes = [1, 1, 1, 256], strides = [1, 1, 1, 1]} : vector<1x3x1x256xf32> to vector<1x1x1x256xf32>
    %13 = vector.shape_cast %12 : vector<1x1x1x256xf32> to vector<1x1x256xf32>
    %cst_5 = arith.constant 4.899000e+03 : f32
    %14 = vector.broadcast %cst_5 : f32 to vector<1x1x256xf32>
    %15 = arith.mulf %9, %14 : vector<1x1x256xf32>
    %cst_6 = arith.constant 9.617000e+03 : f32
    %16 = vector.broadcast %cst_6 : f32 to vector<1x1x256xf32>
    %17 = arith.mulf %11, %16 : vector<1x1x256xf32>
    %18 = arith.addf %15, %17 : vector<1x1x256xf32>
    %cst_7 = arith.constant 1.868000e+03 : f32
    %19 = vector.broadcast %cst_7 : f32 to vector<1x1x256xf32>
    %20 = arith.mulf %13, %19 : vector<1x1x256xf32>
    %21 = arith.addf %18, %20 : vector<1x1x256xf32>
    %cst_8 = arith.constant 8.192000e+03 : f32
    %22 = vector.broadcast %cst_8 : f32 to vector<1x1x256xf32>
    %23 = arith.addf %21, %22 : vector<1x1x256xf32>
    %cst_9 = arith.constant 6.10351563E-5 : f32
    %24 = vector.broadcast %cst_9 : f32 to vector<1x1x256xf32>
    %25 = arith.mulf %23, %24 : vector<1x1x256xf32>
    %26 = math.floor %25 : vector<1x1x256xf32>
    %27 = arith.truncf %26 : vector<1x1x256xf32> to vector<1x1x256xbf16>
    %c0_10 = arith.constant 0 : index
    %c0_11 = arith.constant 0 : index
    %c0_12 = arith.constant 0 : index
    %28 = vector.load %arg3[%c0_10, %c0_11, %c0_12] : memref<1x1x256xbf16, #tpu.memory_space<vmem>>, vector<1x1x256xbf16>
    tpu.vector_store %arg3[%c0_10, %c0_11, %c0_12], %27 {strides = array<i32>} : memref<1x1x256xbf16, #tpu.memory_space<vmem>>, vector<1x1x256xbf16>,
    return
  }
  func.func @transform_0(%arg0: i32, %arg1: i32) -> (i32, i32, i32, i32) {
    %c0_i32 = arith.constant 0 : i32
    %c0_i32_0 = arith.constant 0 : i32
    %c0_i32_1 = arith.constant 0 : i32
    return %arg0, %c0_i32, %arg1, %c0_i32_0 : i32, i32, i32, i32
  }
  func.func @transform_1(%arg0: i32, %arg1: i32) -> (i32, i32, i32) {
    %c0_i32 = arith.constant 0 : i32
    %c0_i32_0 = arith.constant 0 : i32
    return %arg0, %arg1, %c0_i32 : i32, i32, i32
  }
}

</mosaic_0001>

<bundles_post_ra>
// kernel: tpu_custom_call.1
= control target key start
LH: loop header
LB: loop body
LE: loop exit
PB: predicated region body
PF: predicated region fallthrough
CT: control target
= control target key end

     0   :  { %6 = vsyncpa [#allocation3], 0  ;;  %s572_s0 = inlined_call_operand.hbm [shape: f32[2,3,1,256], index: 0, kind: input, shape index: {}]   ;;  %s573_s1 = inlined_call_operand.vmem [shape: bf16[2,1,256], index: 1, kind: output, shape index: {}]  }
   0x1   :  { %8 = vsyncpa [#allocation3 + $0x1], 0  ;;  %s482_s6 = smov 0   ;;  %s484_s7 = smov 0  }
   0x2   :  { %s486_s8 = smov 0   ;;  %s488_s9 = smov 0  }
   0x3   :  { %s490_s10 = smov 0   ;;  %s492_s11 = smov 0  }
   0x4 LB: > { %s317_s12 = sadd.s32 4294967295, %s466_s11   ;;  %s26_s13 = sadd.s32 1, %s462_s10  ;;  %s466_s11 = sphi %s492_s11, %s14_s11   ;;  %s462_s10 = sphi %s490_s10, %s580_s10   ;;  %s458_s9 = sphi %s488_s9, %s579_s9   ;;  %s454_s8 = sphi %s486_s8, %s578_s8   ;;  %s450_s7 = sphi %s484_s7, %s577_s7   ;;  %s446_s6 = sphi %s482_s6, %s576_s6  }
   0x5   : > { %p28_p0 = scmp.ge.s32.totalorder %s26_s13, 2  ;;  %s35_s14 = sadd.s32 1, %s454_s8 }
   0x6   : > { %p42_p1 = scmp.ne.s32.totalorder %s454_s8, %s450_s7  ;;  %p43_p2 = scmp.eq.s32.totalorder %s466_s11, 0 }
   0x7   : > { %s582_s13 = smov (%p28_p0, %s26_s13), 0  ;;  %p48_p4 = scmp.ne.s32.totalorder %s450_s7, %s446_s6 }
   0x8   : > { %p44_p3 = por %p43_p2, %p42_p1  ;;  %s30_s15 = ssub.s32 %s462_s10, %s582_s13 }
   0x9   : > { %p49_p5 = scmp.eq.s32.totalorder %s317_s12, 0  ;;  %p33_p6 = scmp.eq.s32.totalorder %s30_s15, 0 }
   0xa   : > { %p336_p8 = scmp.lt.s32.totalorder %s466_s11, 2  ;;  %s100_s18 = sand.u32 1, %s454_s8  }
   0xb   : > { %p521_p7 = por %p49_p5, %p48_p4  ;;  %s328_s19 = smul.u32 96, %s462_s10 }
   0xc   : > { %s527_s17 = scalar_select %p33_p6, %s454_s8, %s35_s14  }
   0xd   : > { %s327_s20 = smul.u32 6, %s100_s18  ;;  %s112_s23 = scalar_lea.hbm %s572_s0, %s328_s19 }
   0xe   : > { %p534_p9 = pnand %p336_p8, %p44_p3  ;;  %s101_s27 = scalar_lea.sflag [#allocation3], %s100_s18 }
   0xf   : > { %s104_s25 = scalar_lea.vmem [#allocation2], %s327_s20  ;;  %s468_s29 = smov [#allocation2]  }
  0x10   : > { %s113_s26 = sshll.u32 %s104_s25, 4  ;;  %p390_p10 = pneg %p534_p9  ;;  %s114_s26 = int_to_ptr.vmem [resolvable:$true] %s113_s26 }
  0x11   : > { %s401_s28 = scalar_lea.vmem %s114_s26, 96  ;;  %s406_s30 = sshll.u32 %s468_s29, 4  ;;  %s407_s30 = int_to_ptr.vmem [resolvable:$false] %s406_s30 }
  0x12   : > { %p402_p11 = scmp.ne.s32.totalorder %s114_s26, %s401_s28  ;;  %s408_s2 = scalar_lea.vmem %s407_s30, 192 }
  0x13   : > { %p409_p0 = scmp.lt.s32.totalorder %s114_s26, %s407_s30  ;;  %p410_p1 = scmp.lt.s32.totalorder %s408_s2, %s401_s28 }
  0x14   : > { %p404_p12 = pnand %p402_p11, %p390_p10 }
  0x15   : > { %p411_p2 = por %p410_p1, %p409_p0 }
  0x16   : > { %p405_p13 = pneg %p404_p12 }
  0x18   : > { %p412_p3 = pnand %p411_p2, %p405_p13 }
  0x1a   : > { %415 = shalt.err (!%p412_p3)
}
  0x1b   : > { %s469_s3 = smov 32   ;;  %s470_s4 = smov 2  }
  0x1c   : > { %335 = dma.hbm_to_vmem [thread:$0]  (!%p534_p9), %s112_s23, 96, %s114_s26, %s101_s27, %s469_s3, %s469_s3, %s470_s4  }
  0x1d   : > { %p322_p4 = scmp.ge.s32.totalorder %s466_s11, 1  ;;  %p121_p5 = scmp.lt.s32.totalorder %s466_s11, 3 }
  0x1f   : > { %p122_p6 = pnand %p322_p4, %p121_p5 }
  0x20   : > { %s127_s5 = sand.u32 (!%p122_p6), 1, %s450_s7  }
  0x21   : > { %125 = sbr.rel (%p122_p6) target bundleno = 70 (0x46), region = 24  ;;  %s128_s12 = scalar_lea.sflag (!%p122_p6), [#allocation3], %s127_s5 }
  0x22   : > { %s329_s6 = smul.u32 (!%p122_p6), 6, %s127_s5 }
  0x24   : > { %s131_s14 = scalar_lea.vmem (!%p122_p6), [#allocation2], %s329_s6 }
  0x26   : > { %441 = dma.done.wait (%p521_p7), %s128_s12, 96  }
  0x27   : > { %443 = vsyncadd (%p521_p7), %s128_s12, 4294967200  ;;  %v161_v0 = vld [vmem:[%s131_s14] sm:$0x3]  ;;  %v162_v1 = vld [vmem:[%s131_s14 + $0x2] sm:$0x3]  ;;  %v185_v18 = vlaneseq  ;;  %p153_p7 = scmp.lt.s32.totalorder %s458_s9, 1 }
  0x28   : > { %v163_v2 = vld [vmem:[%s131_s14 + $0x4] sm:$0x3]  ;;  %v164_v3 = vmax.f32 %v161_v0, 0.0  ;;  %v165_v4 = vmax.f32 %v162_v1, 0.0  ;;  %v471_v22 = vmov 1966171168  }
  0x29   : > { %v166_v5 = vmax.f32 %v163_v2, 0.0  ;;  %v186_v21 = vshrl.u32 %v185_v18, 7  ;;  %v201_v23 = vunpack.c.l.s4 %v471_v22  ;;  %s584_s9 = smov (!%p153_p7, %s458_s9), 1  ;;  %vm215_vm0 = vcmask 1040384  }
  0x2a   : > { %v167_v6 = vmin.f32 %v164_v3, 1.0  ;;  %v168_v7 = vmin.f32 %v165_v4, 1.0  ;;  %vm216_vm1 = vsmask.f32 256  ;;  %s323_s15 = sshll.u32 %s584_s9, 1  ;;  %vm218_vm2 = vcmask 1041409  }
  0x2b   : > { %v169_v8 = vmin.f32 %v166_v5, 1.0  ;;  %v187_v26 = vsub.s32 0, %v186_v21  ;;  %v191_v27 = vsub.s32 1, %v186_v21  ;;  %v202_v28 = vunpack.c.0.s8 %v201_v23  ;;  %vm217_vm4 = vmand %vm215_vm0, %vm216_vm1  ;;  %s160_s19 = scalar_lea.vmem %s573_s1, %s323_s15 }
  0x2c   : > { %v170_v9 = vmul.f32 255.0, %v167_v6  ;;  %v171_v10 = vmul.f32 255.0, %v168_v7  ;;  %vm219_vm3 = vsmask.f32 1280  ;;  %v222_v35 = vld [vmem:[%s160_s19] sm:$0x3] }
  0x2d   : > { %v172_v11 = vmul.f32 255.0, %v169_v8  ;;  %v205_v32 = vsub.s32 %v202_v28, %v186_v21  ;;  %vm220_vm5 = vmand %vm218_vm2, %vm219_vm3 }
  0x2e   : > { %v173_v12 = vfloor.f32 %v170_v9  ;;  %v174_v13 = vfloor.f32 %v171_v10  ;;  %vm221_vm6 = vmor %vm220_vm5, %vm217_vm4 }
  0x2f   : > { %v175_v14 = vfloor.f32 %v172_v11 }
  0x30   : > { %v176_v15 = vmul.f32 4899.0, %v173_v12  ;;  %v177_v16 = vmul.f32 9617.0, %v174_v13 }
  0x31   : > { %v179_v17 = vmul.f32 1868.0, %v175_v14 }
  0x32   : > { %v178_v19 = vadd.f32 %v177_v16, %v176_v15 }
  0x34   : > { %v180_v20 = vadd.f32 %v179_v17, %v178_v19 }
  0x36   : > { %v181_v24 = vadd.f32 8192.0, %v180_v20 }
  0x38   : > { %v182_v25 = vmul.f32 6.1035156e-05, %v181_v24 }
  0x3a   : > { %v183_v29 = vfloor.f32 %v182_v25 }
  0x3c   : > { %v188_v30 = vrot.slane %v183_v29, %v187_v26  ;;  %v192_v31 = vrot.slane %v183_v29, %v191_v27 }
  0x3e   : > { %v324_v33 = vpack.c.bf16 %v192_v31, %v188_v30 }
  0x40   : > { %v206_v34 = vrot.slane %v324_v33, %v205_v32 }
  0x42   : > { %v213_v36 = vrot.slane %v206_v34, %v205_v32 }
  0x44   : > { %v223_v37 = vsel %vm221_vm6, %v213_v36, %v222_v35 }
  0x45   : > { %224 = vst [vmem:[%s160_s19] sm:$0x3] %v223_v37 }
  0x46 PF: > { %s14_s11 = sadd.s32 1, %s466_s11   ;;  %s576_s6 = smov %s450_s7 }
  0x47   : > { %p11_p8 = scmp.ge.s32.totalorder %s14_s11, 4   ;;  %s577_s7 = smov %s454_s8 }
  0x48   : > { %s578_s8 = smov %s527_s17  ;;  %s579_s9 = smov %s462_s10 }
  0x49   : > { %s580_s10 = smov %s582_s13  ;;  %13 = sbr.rel (!%p11_p8) target bundleno = 4 (0x4), region = 64 }
  0x4e   :  { %252 = vsyncpa [#allocation3], 1 }
  0x4f   :  { %254 = vsyncpa [#allocation3 + $0x1], 1 }

</bundles_post_ra>
